<compile_context>
chip_gen: v5e
topology: v5e:2x2
jax: 0.10.0
libtpu: 0.0.40
codegen_flags: <defaults>
</compile_context>

<pallas_src>
import jax
import jax.numpy as jnp
from jax import lax
from jax.experimental import pallas as pl
from jax.experimental.pallas import tpu as pltpu

LANE = 128      # vreg lane width (last dim)
SUBLANE = 8     # fp32 sublane count (second-to-last dim)


def _round_up(x, m):
    return (x + m - 1) // m * m


def _vmem_capacity_bytes(default=64 * 1024 * 1024):
    """Physical VMEM per TensorCore (v5e/v6e: 128 MiB, v7x: 64 MiB); conservative default."""
    try:
        cap = int(pltpu.get_tpu_info().vmem_capacity_bytes)
        if cap > 0:
            return cap
    except Exception:
        pass
    return default


def _single_buffered_spec(block_shape, index_map):
    """BlockSpec for grid-resident operands (constant index_map): single-buffer them so
    they cost 1x (not 2x) VMEM. Falls back to the default spec if pipeline_mode is
    unavailable in the installed jax."""
    try:
        return pl.BlockSpec(block_shape, index_map, pipeline_mode=pl.Buffered(1))
    except Exception:
        return pl.BlockSpec(block_shape, index_map)


# --------------------------------------------------------------------------------------
# Kernels
# --------------------------------------------------------------------------------------

def _embedder_resident_kernel(x_ref, w_in_ref, b_in_ref, w_hid_ref, b_hid_ref,
                              o_ref, y_acc):
    """One (TM, d_model_p) output tile; the full weight stack is VMEM-resident.

    x_ref:     (TM, d_in_p)                    original dtype (cast to bf16 in-kernel)
    w_in_ref:  (d_in_p, d_model_p)             bf16, resident across the grid
    b_in_ref:  (1, d_model_p)                  fp32
    w_hid_ref: (nlayers, d_model_p, d_model_p) bf16, resident across the grid
    b_hid_ref: (nlayers, 1, d_model_p)         fp32
    o_ref:     (TM, d_model_p)                 output dtype
    y_acc:     (TM, d_model_p)                 fp32 VMEM scratch accumulator
    """
    cd = w_in_ref.dtype
    # input_layer: bf16 x bf16 on the MXU, fp32 accumulate; bias add in fp32 (VPU).
    y_acc[...] = (
        jnp.dot(x_ref[...].astype(cd), w_in_ref[...],
                preferred_element_type=jnp.float32)
        + b_in_ref[...]
    )

    nlayers = w_hid_ref.shape[0]  # static Python int

    def layer(i, carry):
        y = jnp.maximum(y_acc[...], 0.0)                      # ReLU on fp32 vregs
        y_acc[...] = (
            jnp.dot(y.astype(cd), w_hid_ref[i],               # bf16 MXU, fp32 acc
                    preferred_element_type=jnp.float32)
            + b_hid_ref[i]
        )
        return carry

    # Staging through the VMEM scratch + unrolled fori_loop bounds live ranges per layer.
    lax.fori_loop(0, nlayers, layer, 0, unroll=True)

    o_ref[...] = y_acc[...].astype(o_ref.dtype)


def _embedder_streamed_kernel(x_ref, w_in_ref, b_in_ref, w_hid_ref, b_hid_ref,
                              o_ref, y_acc):
    """Fallback for weight stacks that don't fit VMEM: grid axis 1 walks the layers,
    streaming one (double-buffered) w_hid layer per step; y_acc carries across steps."""
    l = pl.program_id(1)
    cd = w_in_ref.dtype

    @pl.when(l == 0)
    def _():
        y_acc[...] = (
            jnp.dot(x_ref[...].astype(cd), w_in_ref[...],
                    preferred_element_type=jnp.float32)
            + b_in_ref[...]
        )

    @pl.when(l > 0)
    def _():
        y = jnp.maximum(y_acc[...], 0.0)
        y_acc[...] = (
            jnp.dot(y.astype(cd), w_hid_ref[0],
                    preferred_element_type=jnp.float32)
            + b_hid_ref[0]
        )

    @pl.when(l == pl.num_programs(1) - 1)
    def _():
        o_ref[...] = y_acc[...].astype(o_ref.dtype)


# --------------------------------------------------------------------------------------
# Host-side wrappers
# --------------------------------------------------------------------------------------

def prepare_params(w_in, b_in, w_hid, b_hid, *, compute_dtype=jnp.bfloat16):
    """Cast weights to the MXU compute dtype and lane-pad feature dims ONCE (do this at
    init / checkpoint load, not per forward call). Zero padding is exact: padded input
    columns hit zero weight rows, and padded output columns stay zero through every
    ReLU + Linear (zero weight columns / zero bias entries)."""
    d_input, d_model = w_in.shape
    nlayers = w_hid.shape[0]
    d_in_p = _round_up(d_input, LANE)
    d_model_p = _round_up(d_model, LANE)

    w_in_p = jnp.pad(w_in.astype(compute_dtype),
                     ((0, d_in_p - d_input), (0, d_model_p - d_model)))
    b_in_p = jnp.pad(b_in.astype(jnp.float32),
                     (0, d_model_p - d_model)).reshape(1, d_model_p)
    w_hid_p = jnp.pad(w_hid.astype(compute_dtype),
                      ((0, 0), (0, d_model_p - d_model), (0, d_model_p - d_model)))
    b_hid_p = jnp.pad(b_hid.astype(jnp.float32),
                      ((0, 0), (0, d_model_p - d_model))).reshape(nlayers, 1, d_model_p)
    return {"w_in": w_in_p, "b_in": b_in_p, "w_hid": w_hid_p, "b_hid": b_hid_p,
            "d_input": d_input, "d_model": d_model}


def embedder_forward(x, params, *, block_m=1024, out_dtype=None):
    """x: (batch, seq, d_input) -> (batch, seq, d_model). `params` from prepare_params."""
    batch, seq, d_input = x.shape
    assert d_input == params["d_input"], "d_input mismatch with prepared params"
    d_model = params["d_model"]
    w_in_p, b_in_p = params["w_in"], params["b_in"]
    w_hid_p, b_hid_p = params["w_hid"], params["b_hid"]
    d_in_p, d_model_p = w_in_p.shape
    nlayers = w_hid_p.shape[0]
    assert nlayers >= 1, "kernel assumes at least one hidden Linear (nlayers >= 1)"
    out_dtype = jnp.dtype(x.dtype) if out_dtype is None else jnp.dtype(out_dtype)

    m = batch * seq
    m8 = _round_up(m, SUBLANE)
    x_bytes = jnp.dtype(x.dtype).itemsize
    w_bytes = jnp.dtype(w_in_p.dtype).itemsize
    out_bytes = out_dtype.itemsize

    # Per-generation VMEM budget/limit (v5e/v6e 128 MiB, v7x 64 MiB).
    vmem_cap = _vmem_capacity_bytes()
    budget = int(vmem_cap * 0.75)     # tile-selection budget
    ceiling = int(vmem_cap * 0.85)    # never request the whole part (compiler scratch)

    # Per-row VMEM cost (bytes), shared by both paths.
    row_cost = (2 * d_in_p * x_bytes                  # double-buffered x tile
                + 2 * d_model_p * out_bytes           # double-buffered output tile
                + d_model_p * 4                       # fp32 accumulator scratch
                + 2 * max(d_in_p, d_model_p) * 4)     # ReLU / bf16-cast temporaries

    bias_row = SUBLANE * d_model_p * 4                # fp32 bias tile (8-sublane padded)
    fixed_resident = ((d_in_p + nlayers * d_model_p) * d_model_p * w_bytes  # single-buffered
                      + (nlayers + 1) * bias_row)
    fixed_streamed = (d_in_p * d_model_p * w_bytes + bias_row               # resident w_in/b_in
                      + 2 * (d_model_p * d_model_p * w_bytes + bias_row))   # 2-deep layer stream

    def pick_tm(fixed):
        avail = budget - fixed
        if avail <= 0:
            return 0
        tm = (avail // row_cost) // SUBLANE * SUBLANE
        return int(min(tm, block_m, m8))

    tm_res = pick_tm(fixed_resident)
    use_resident = tm_res >= min(128, m8)   # residency must still allow decent MXU tiles
    tm = tm_res if use_resident else pick_tm(fixed_streamed)
    tm = max(tm, SUBLANE)

    # Keep both v7x TensorCores busy: "parallel" M axis needs >= 2 grid steps.
    if m8 // tm < 2 and m8 >= 2 * SUBLANE:
        tm = max(SUBLANE, (m8 // 2) // SUBLANE * SUBLANE)

    m_pad = _round_up(m, tm)
    est = (fixed_resident if use_resident else fixed_streamed) + tm * row_cost
    vmem_limit = int(min(ceiling, max(32 * 1024 * 1024, est + 10 * 1024 * 1024)))

    # Pad rows / input features only when needed; NO wrapper-side dtype cast of x
    # (the bf16 cast happens on the VPU inside the kernel, hidden under the MXU).
    x2d = x.reshape(m, d_input)
    if m_pad != m or d_in_p != d_input:
        x2d = jnp.pad(x2d, ((0, m_pad - m), (0, d_in_p - d_input)))

    if use_resident:
        out2d = pl.pallas_call(
            _embedder_resident_kernel,
            out_shape=jax.ShapeDtypeStruct((m_pad, d_model_p), out_dtype),
            grid=(m_pad // tm,),
            in_specs=[
                # x tile streams over the grid; weights/biases keep a constant block
                # index -> DMA'd once, resident in VMEM, single-buffered.
                pl.BlockSpec((tm, d_in_p), lambda i: (i, 0)),
                _single_buffered_spec((d_in_p, d_model_p), lambda i: (0, 0)),
                _single_buffered_spec((1, d_model_p), lambda i: (0, 0)),
                _single_buffered_spec((nlayers, d_model_p, d_model_p),
                                      lambda i: (0, 0, 0)),
                _single_buffered_spec((nlayers, 1, d_model_p), lambda i: (0, 0, 0)),
            ],
            out_specs=pl.BlockSpec((tm, d_model_p), lambda i: (i, 0)),
            scratch_shapes=[pltpu.VMEM((tm, d_model_p), jnp.float32)],
            compiler_params=pltpu.CompilerParams(
                dimension_semantics=("parallel",),     # rows independent -> megacore
                vmem_limit_bytes=vmem_limit,
            ),
        )(x2d, w_in_p, b_in_p, w_hid_p, b_hid_p)
    else:
        # Streamed-weight fallback: layer axis is "arbitrary", one w_hid layer per step.
        # TODO(synk): on v5e with very small M the up-front w_in DMA could also be hidden
        # behind a prior pallas_call (cross-call future); not implemented here.
        out2d = pl.pallas_call(
            _embedder_streamed_kernel,
            out_shape=jax.ShapeDtypeStruct((m_pad, d_model_p), out_dtype),
            grid=(m_pad // tm, nlayers + 1),
            in_specs=[
                pl.BlockSpec((tm, d_in_p), lambda i, l: (i, 0)),
                _single_buffered_spec((d_in_p, d_model_p), lambda i, l: (0, 0)),
                _single_buffered_spec((1, d_model_p), lambda i, l: (0, 0)),
                pl.BlockSpec((1, d_model_p, d_model_p),
                             lambda i, l: (jnp.maximum(l - 1, 0), 0, 0)),
                pl.BlockSpec((1, 1, d_model_p),
                             lambda i, l: (jnp.maximum(l - 1, 0), 0, 0)),
            ],
            out_specs=pl.BlockSpec((tm, d_model_p), lambda i, l: (i, 0)),
            scratch_shapes=[pltpu.VMEM((tm, d_model_p), jnp.float32)],
            compiler_params=pltpu.CompilerParams(
                dimension_semantics=("parallel", "arbitrary"),
                vmem_limit_bytes=vmem_limit,
            ),
        )(x2d, w_in_p, b_in_p, w_hid_p, b_hid_p)

    return out2d[:m, :d_model].reshape(batch, seq, d_model)


# --------------------------------------------------------------------------------------
# Synthetic params + pure-JAX reference
# --------------------------------------------------------------------------------------

def init_params(key, nlayers, d_input, d_model, dtype=jnp.float32):
    """Deterministic synthetic init (uniform, torch-Linear-like scale). Weights stored
    (in_features, out_features) so the kernel does x @ W + b == torch x @ W_t.T + b."""
    keys = jax.random.split(key, 2 + 2 * nlayers)
    lim_in = 1.0 / jnp.sqrt(d_input)
    w_in = jax.random.uniform(keys[0], (d_input, d_model), dtype, -lim_in, lim_in)
    b_in = jax.random.uniform(keys[1], (d_model,), dtype, -lim_in, lim_in)

    lim_h = 1.0 / jnp.sqrt(d_model)
    w_hid, b_hid = [], []
    for i in range(nlayers):
        w_hid.append(jax.random.uniform(keys[2 + 2 * i], (d_model, d_model),
                                        dtype, -lim_h, lim_h))
        b_hid.append(jax.random.uniform(keys[3 + 2 * i], (d_model,),
                                        dtype, -lim_h, lim_h))
    return w_in, b_in, jnp.stack(w_hid, 0), jnp.stack(b_hid, 0)


def reference_forward(x, w_in, b_in, w_hid, b_hid, compute_dtype=jnp.bfloat16):
    """Pure-JAX reference matching torch semantics, with the same bf16-operand /
    fp32-accumulate quantization as the kernel (tight tolerance check)."""
    cd = compute_dtype
    y = jnp.dot(x.astype(cd), w_in.astype(cd),
                preferred_element_type=jnp.float32) + b_in.astype(jnp.float32)
    for i in range(w_hid.shape[0]):
        y = jnp.maximum(y, 0.0)
        y = jnp.dot(y.astype(cd), w_hid[i].astype(cd),
                    preferred_element_type=jnp.float32) + b_hid[i].astype(jnp.float32)
    return y.astype(x.dtype)


if __name__ == "__main__":
    key = jax.random.PRNGKey(0)
    k_x, k_p = jax.random.split(key)

    # Small shapes consistent with the module's forward (Linear over the last dim).
    batch, seq = 2, 8
    nlayers, d_input, d_model = 2, 16, 32

    x = jax.random.normal(k_x, (batch, seq, d_input), dtype=jnp.float32)
    w_in, b_in, w_hid, b_hid = init_params(k_p, nlayers, d_input, d_model)

    params = prepare_params(w_in, b_in, w_hid, b_hid)       # cast/pad weights ONCE
    out = embedder_forward(x, params)
    out = jax.block_until_ready(out)

    ref = reference_forward(x, w_in, b_in, w_hid, b_hid)
    assert out.shape == (batch, seq, d_model)
    assert jnp.allclose(out, ref, atol=5e-3, rtol=5e-3), "mismatch vs reference"

    print("KERNEL_OK")
</pallas_src>

<mosaic_0001>
module attributes {stable_mosaic.version = 11 : i64} {
  func.func @_embedder_resident_kernel(%arg0: i32, %arg1: memref<8x128xf32, #tpu.memory_space<vmem>>, %arg2: memref<128x128xbf16, #tpu.memory_space<vmem>>, %arg3: memref<1x128xf32, #tpu.memory_space<vmem>>, %arg4: memref<2x128x128xbf16, #tpu.memory_space<vmem>>, %arg5: memref<2x1x128xf32, #tpu.memory_space<vmem>>, %arg6: memref<8x128xf32, #tpu.memory_space<vmem>>, %arg7: memref<8x128xf32, #tpu.memory_space<vmem>>) attributes {dimension_semantics = [#tpu.dimension_semantics<parallel>], iteration_bounds = array<i64: 2>, scalar_prefetch = 0 : i64, scratch_operands = 1 : i64, tpu.core_type = #tpu.core_type<tc>, window_params = [{transform_indices = @transform_0, window_bounds = array<i64: 8, 128>}, {pipeline_mode = #tpu.pipeline_mode<synchronous>, transform_indices = @transform_1, window_bounds = array<i64: 128, 128>}, {pipeline_mode = #tpu.pipeline_mode<synchronous>, transform_indices = @transform_2, window_bounds = array<i64: 1, 128>}, {pipeline_mode = #tpu.pipeline_mode<synchronous>, transform_indices = @transform_3, window_bounds = array<i64: 2, 128, 128>}, {pipeline_mode = #tpu.pipeline_mode<synchronous>, transform_indices = @transform_4, window_bounds = array<i64: 2, 1, 128>}, {transform_indices = @transform_5, window_bounds = array<i64: 8, 128>}]} {
    %c0 = arith.constant 0 : index
    %c0_0 = arith.constant 0 : index
    %0 = vector.load %arg1[%c0, %c0_0] : memref<8x128xf32, #tpu.memory_space<vmem>>, vector<8x128xf32>
    %1 = arith.truncf %0 : vector<8x128xf32> to vector<8x128xbf16>
    %c0_1 = arith.constant 0 : index
    %c0_2 = arith.constant 0 : index
    %2 = vector.load %arg2[%c0_1, %c0_2] : memref<128x128xbf16, #tpu.memory_space<vmem>>, vector<128x128xbf16>
    %cst = arith.constant dense<0.000000e+00> : vector<8x128xf32>
    %3 = tpu.matmul %1, %2, %cst {dimension_numbers = #tpu.dot_dimension_numbers<[1], [0], [0], [1], [0, 0, 1, 1], [], []>} : vector<8x128xbf16>, vector<128x128xbf16>, vector<8x128xf32> -> vector<8x128xf32>
    %c0_3 = arith.constant 0 : index
    %c0_4 = arith.constant 0 : index
    %4 = vector.load %arg3[%c0_3, %c0_4] : memref<1x128xf32, #tpu.memory_space<vmem>>, vector<1x128xf32>
    %5 = vector.broadcast %4 : vector<1x128xf32> to vector<8x128xf32>
    %6 = arith.addf %3, %5 : vector<8x128xf32>
    %c0_5 = arith.constant 0 : index
    %c0_6 = arith.constant 0 : index
    %7 = vector.load %arg7[%c0_5, %c0_6] : memref<8x128xf32, #tpu.memory_space<vmem>>, vector<8x128xf32>
    tpu.vector_store %arg7[%c0_5, %c0_6], %6 {strides = array<i32>} : memref<8x128xf32, #tpu.memory_space<vmem>>, vector<8x128xf32>,
    %c0_i32 = arith.constant 0 : i32
    %c0_7 = arith.constant 0 : index
    %c0_8 = arith.constant 0 : index
    %8 = vector.load %arg7[%c0_7, %c0_8] : memref<8x128xf32, #tpu.memory_space<vmem>>, vector<8x128xf32>
    %cst_9 = arith.constant 0.000000e+00 : f32
    %9 = vector.broadcast %cst_9 : f32 to vector<8x128xf32>
    %10 = arith.maximumf %8, %9 : vector<8x128xf32>
    %11 = arith.truncf %10 : vector<8x128xf32> to vector<8x128xbf16>
    %12 = arith.index_cast %c0_i32 : i32 to index
    %c0_10 = arith.constant 0 : index
    %c0_11 = arith.constant 0 : index
    %13 = vector.load %arg4[%12, %c0_10, %c0_11] : memref<2x128x128xbf16, #tpu.memory_space<vmem>>, vector<1x128x128xbf16>
    %14 = vector.shape_cast %13 : vector<1x128x128xbf16> to vector<128x128xbf16>
    %cst_12 = arith.constant dense<0.000000e+00> : vector<8x128xf32>
    %15 = tpu.matmul %11, %14, %cst_12 {dimension_numbers = #tpu.dot_dimension_numbers<[1], [0], [0], [1], [0, 0, 1, 1], [], []>} : vector<8x128xbf16>, vector<128x128xbf16>, vector<8x128xf32> -> vector<8x128xf32>
    %16 = arith.index_cast %c0_i32 : i32 to index
    %c0_13 = arith.constant 0 : index
    %c0_14 = arith.constant 0 : index
    %17 = vector.load %arg5[%16, %c0_13, %c0_14] : memref<2x1x128xf32, #tpu.memory_space<vmem>>, vector<1x1x128xf32>
    %18 = vector.shape_cast %17 : vector<1x1x128xf32> to vector<1x128xf32>
    %19 = vector.broadcast %18 : vector<1x128xf32> to vector<8x128xf32>
    %20 = arith.addf %15, %19 : vector<8x128xf32>
    %c0_15 = arith.constant 0 : index
    %c0_16 = arith.constant 0 : index
    %21 = vector.load %arg7[%c0_15, %c0_16] : memref<8x128xf32, #tpu.memory_space<vmem>>, vector<8x128xf32>
    tpu.vector_store %arg7[%c0_15, %c0_16], %20 {strides = array<i32>} : memref<8x128xf32, #tpu.memory_space<vmem>>, vector<8x128xf32>,
    %c1_i32 = arith.constant 1 : i32
    %c0_17 = arith.constant 0 : index
    %c0_18 = arith.constant 0 : index
    %22 = vector.load %arg7[%c0_17, %c0_18] : memref<8x128xf32, #tpu.memory_space<vmem>>, vector<8x128xf32>
    %cst_19 = arith.constant 0.000000e+00 : f32
    %23 = vector.broadcast %cst_19 : f32 to vector<8x128xf32>
    %24 = arith.maximumf %22, %23 : vector<8x128xf32>
    %25 = arith.truncf %24 : vector<8x128xf32> to vector<8x128xbf16>
    %26 = arith.index_cast %c1_i32 : i32 to index
    %c0_20 = arith.constant 0 : index
    %c0_21 = arith.constant 0 : index
    %27 = vector.load %arg4[%26, %c0_20, %c0_21] : memref<2x128x128xbf16, #tpu.memory_space<vmem>>, vector<1x128x128xbf16>
    %28 = vector.shape_cast %27 : vector<1x128x128xbf16> to vector<128x128xbf16>
    %cst_22 = arith.constant dense<0.000000e+00> : vector<8x128xf32>
    %29 = tpu.matmul %25, %28, %cst_22 {dimension_numbers = #tpu.dot_dimension_numbers<[1], [0], [0], [1], [0, 0, 1, 1], [], []>} : vector<8x128xbf16>, vector<128x128xbf16>, vector<8x128xf32> -> vector<8x128xf32>
    %30 = arith.index_cast %c1_i32 : i32 to index
    %c0_23 = arith.constant 0 : index
    %c0_24 = arith.constant 0 : index
    %31 = vector.load %arg5[%30, %c0_23, %c0_24] : memref<2x1x128xf32, #tpu.memory_space<vmem>>, vector<1x1x128xf32>
    %32 = vector.shape_cast %31 : vector<1x1x128xf32> to vector<1x128xf32>
    %33 = vector.broadcast %32 : vector<1x128xf32> to vector<8x128xf32>
    %34 = arith.addf %29, %33 : vector<8x128xf32>
    %c0_25 = arith.constant 0 : index
    %c0_26 = arith.constant 0 : index
    %35 = vector.load %arg7[%c0_25, %c0_26] : memref<8x128xf32, #tpu.memory_space<vmem>>, vector<8x128xf32>
    tpu.vector_store %arg7[%c0_25, %c0_26], %34 {strides = array<i32>} : memref<8x128xf32, #tpu.memory_space<vmem>>, vector<8x128xf32>,
    %c2_i32 = arith.constant 2 : i32
    %c0_27 = arith.constant 0 : index
    %c0_28 = arith.constant 0 : index
    %36 = vector.load %arg7[%c0_27, %c0_28] : memref<8x128xf32, #tpu.memory_space<vmem>>, vector<8x128xf32>
    %c0_29 = arith.constant 0 : index
    %c0_30 = arith.constant 0 : index
    %37 = vector.load %arg6[%c0_29, %c0_30] : memref<8x128xf32, #tpu.memory_space<vmem>>, vector<8x128xf32>
    tpu.vector_store %arg6[%c0_29, %c0_30], %36 {strides = array<i32>} : memref<8x128xf32, #tpu.memory_space<vmem>>, vector<8x128xf32>,
    return
  }
  func.func @transform_0(%arg0: i32) -> (i32, i32) {
    %c0_i32 = arith.constant 0 : i32
    %c0_i32_0 = arith.constant 0 : i32
    return %arg0, %c0_i32 : i32, i32
  }
  func.func @transform_1(%arg0: i32) -> (i32, i32) {
    %c0_i32 = arith.constant 0 : i32
    %c0_i32_0 = arith.constant 0 : i32
    %c0_i32_1 = arith.constant 0 : i32
    return %c0_i32, %c0_i32_0 : i32, i32
  }
  func.func @transform_2(%arg0: i32) -> (i32, i32) {
    %c0_i32 = arith.constant 0 : i32
    %c0_i32_0 = arith.constant 0 : i32
    %c0_i32_1 = arith.constant 0 : i32
    return %c0_i32, %c0_i32_0 : i32, i32
  }
  func.func @transform_3(%arg0: i32) -> (i32, i32, i32) {
    %c0_i32 = arith.constant 0 : i32
    %c0_i32_0 = arith.constant 0 : i32
    %c0_i32_1 = arith.constant 0 : i32
    %c0_i32_2 = arith.constant 0 : i32
    return %c0_i32, %c0_i32_0, %c0_i32_1 : i32, i32, i32
  }
  func.func @transform_4(%arg0: i32) -> (i32, i32, i32) {
    %c0_i32 = arith.constant 0 : i32
    %c0_i32_0 = arith.constant 0 : i32
    %c0_i32_1 = arith.constant 0 : i32
    %c0_i32_2 = arith.constant 0 : i32
    return %c0_i32, %c0_i32_0, %c0_i32_1 : i32, i32, i32
  }
  func.func @transform_5(%arg0: i32) -> (i32, i32) {
    %c0_i32 = arith.constant 0 : i32
    %c0_i32_0 = arith.constant 0 : i32
    return %arg0, %c0_i32 : i32, i32
  }
}

</mosaic_0001>

<bundles_post_ra>
// kernel: tpu_custom_call.1
= control target key start
LH: loop header
LB: loop body
LE: loop exit
PB: predicated region body
PF: predicated region fallthrough
CT: control target
= control target key end

     0   :  { %10 = vsyncpa [#allocation4], 0  ;;  %s1204_s0 = inlined_call_operand.hbm [shape: f32[16,128], index: 0, kind: input, shape index: {}]   ;;  %s1205_s1 = inlined_call_operand.hbm [shape: bf16[128,128], index: 1, kind: input, shape index: {}]   ;;  %s1206_s2 = inlined_call_operand.vmem [shape: f32[1,128], index: 2, kind: input, shape index: {}]   ;;  %s1207_s3 = inlined_call_operand.hbm [shape: bf16[2,128,128], index: 3, kind: input, shape index: {}]   ;;  %s1208_s4 = inlined_call_operand.vmem [shape: f32[2,1,128], index: 4, kind: input, shape index: {}]   ;;  %s1209_s5 = inlined_call_operand.hbm [shape: f32[16,128], index: 5, kind: output, shape index: {}]  }
   0x1   :  { %12 = vsyncpa [#allocation4 + $0x1], 0 }
   0x2   :  { %13 = vsyncpa [#allocation7], 0 }
   0x3   :  { %14 = vsyncpa [#allocation5], 0 }
   0x4   :  { %16 = vsyncpa [#allocation5 + $0x1], 0  ;;  %s1043_s18 = smov 0   ;;  %s1045_s19 = smov 0  }
   0x5   :  { %s1047_s20 = smov 0   ;;  %s1049_s21 = smov 0  }
   0x6 LB: > { %s174_s24 = sshll.u32 %s1205_s1, 4  ;;  %s1067_s25 = sadd.s32 4294967295, %s1007_s21   ;;  %s1007_s21 = sphi %s1049_s21, %s1220_s21   ;;  %s1003_s20 = sphi %s1047_s20, %s1219_s20   ;;  %s999_s19 = sphi %s1045_s19, %s1218_s19   ;;  %s995_s18 = sphi %s1043_s18, %s1217_s18   ;;  %s175_s24 = int_to_ptr.hbm [resolvable:$true] %s174_s24 }
   0x7   : > { %p639_p0 = scmp.ge.s32.totalorder %s1007_s21, 1  ;;  %p43_p1 = scmp.eq.s32.totalorder %s1067_s25, 0 }
   0x8   : > { %p163_p2 = scmp.lt.s32.totalorder %s1007_s21, 3  ;;  %s1009_s27 = smov [#allocation6]  }
   0x9   : > { %s176_s28 = sshll.u32 %s1009_s27, 4  ;;  %s191_s6 = sshll.u32 %s1207_s3, 4  ;;  %s177_s28 = int_to_ptr.vmem [resolvable:$true] %s176_s28  ;;  %s192_s6 = int_to_ptr.hbm [resolvable:$true] %s191_s6 }
   0xa   : > { %p1072_p3 = pnand %p639_p0, %p163_p2  ;;  %s1010_s7 = smov [#allocation8]  }
   0xb   : > { %s193_s8 = sshll.u32 %s1010_s7, 4  ;;  %s1011_s9 = smov 64   ;;  %s194_s8 = int_to_ptr.vmem [resolvable:$true] %s193_s8 }
   0xc   : > { %p787_p4 = pneg %p1072_p3  ;;  %s1012_s10 = smov 4  }
   0xd   : > { %s638_s11 = sadd.s32 4294967294, %s1007_s21   ;;  %s1086_s12 = sadd.s32 1, %s1007_s21  }
   0xe   : > { %p788_p6 = pnand %p787_p4, %p43_p1  ;;  %s26_s13 = ssub.s32 %s1007_s21, %s1086_s12 }
   0xf   : > { %s29_s14 = sadd.s32 1, %s1003_s20  ;;  %p27_p7 = scmp.eq.s32.totalorder %s26_s13, 0 }
  0x10   : > { %790 = dma.hbm_to_vmem [thread:$0]  (!%p788_p6), %s175_s24, 1024, %s177_s28, [#allocation7], %s1011_s9, %s1011_s9, %s1012_s10  }
  0x11   : > { %793 = dma.hbm_to_vmem [thread:$0]  (!%p788_p6), %s192_s6, 2048, %s194_s8, [#allocation7], %s1011_s9, %s1011_s9, %s1012_s10  }
  0x12   : > { %p36_p8 = scmp.ne.s32.totalorder %s1003_s20, %s999_s19  ;;  %p37_p9 = scmp.eq.s32.totalorder %s1007_s21, 0 }
  0x13   : > { %p42_p10 = scmp.ne.s32.totalorder %s999_s19, %s995_s18  ;;  %p150_p13 = scmp.eq.s32.totalorder %s1067_s25, 1 }
  0x14   : > { %s1097_s15 = scalar_select %p27_p7, %s1003_s20, %s29_s14  }
  0x15   : > { %p1099_p11 = por %p37_p9, %p36_p8  ;;  %p1105_p12 = por %p43_p1, %p42_p10 }
  0x16   : > { %p156_p0 = scmp.eq.s32.totalorder %s638_s11, 1  ;;  %p804_p2 = scmp.lt.s32.totalorder %s1007_s21, 2 }
  0x17   : > { %s210_s22 = sand.u32 1, %s1003_s20   ;;  %p1112_p4 = por %p150_p13, %p36_p8 }
  0x18   : > { %p1116_p6 = por %p156_p0, %p42_p10  ;;  %s643_s27 = sshll.u32 %s210_s22, 3 }
  0x19   : > { %s644_s28 = sshll.u32 %s1007_s21, 3  ;;  %s214_s7 = scalar_lea.vmem [#allocation3], %s643_s27 }
  0x1a   : > { %s218_s6 = scalar_lea.hbm %s1204_s0, %s644_s28  ;;  %s222_s8 = sshll.u32 %s214_s7, 4  ;;  %s223_s8 = int_to_ptr.vmem [resolvable:$true] %s222_s8 }
  0x1b   : > { %s220_s9 = sshll.u32 %s218_s6, 4  ;;  %p1126_p7 = pnand %p804_p2, %p1099_p11  ;;  %s221_s9 = int_to_ptr.hbm [resolvable:$true] %s220_s9 }
  0x1c   : > { %s211_s11 = scalar_lea.sflag [#allocation4], %s210_s22  ;;  %s907_s13 = sshra.s32 %s221_s9, 4  ;;  %s908_s13 = int_to_ptr.hbm [resolvable:$true] %s907_s13 }
  0x1d   : > { %s909_s14 = scalar_lea.hbm %s908_s13, 8  ;;  %p911_p9 = pneg %p1126_p7 }
  0x1e   : > { %p910_p8 = scmp.ne.s32.totalorder %s908_s13, %s909_s14  ;;  %s914_s29 = scalar_lea.hbm %s1204_s0, 16 }
  0x1f   : > { %p915_p11 = scmp.lt.s32.totalorder %s908_s13, %s1204_s0  ;;  %p916_p0 = scmp.lt.s32.totalorder %s914_s29, %s909_s14 }
  0x20   : > { %p912_p10 = pnand %p911_p9, %p910_p8 }
  0x21   : > { %p917_p2 = por %p916_p0, %p915_p11 }
  0x22   : > { %p913_p13 = pneg %p912_p10 }
  0x24   : > { %p918_p5 = pnand %p917_p2, %p913_p13 }
  0x26   : > { %921 = shalt.err (!%p918_p5)
}
  0x27   : > { %797 = dma.hbm_to_vmem [thread:$0]  (!%p1126_p7), %s221_s9, 128, %s223_s8, %s211_s11  }
  0x28   : > { %231 = sbr.rel (%p1072_p3) target bundleno = 484 (0x1e4), region = 40  ;;  %s1143_s22 = sand.u32 (!%p1072_p3), 1, %s999_s19  }
  0x29   : > { %s646_s6 = sshll.u32 (!%p1072_p3), %s1143_s22, 3  ;;  %s234_s7 = scalar_lea.sflag (!%p1072_p3), [#allocation4], %s1143_s22 }
  0x2a   : > { %s1149_s13 = scalar_lea.vmem (!%p1072_p3), [#allocation3], %s646_s6 }
  0x2d   : > { %982 = dma.done.wait (%p1105_p12), %s234_s7, 128  }
  0x2e   : > { %984 = vsyncadd (%p1105_p12), %s234_s7, 4294967168 }
  0x2f   : > { %986 = dma.done.wait (%p43_p1), [#allocation7], 3072  }
  0x30   : > { %988 = vsyncadd (%p43_p1), [#allocation7], 4294964224  ;;  %v758_v0 = vld [vmem:[#allocation6 + $0x38] sm:$0xff]  ;;  %v757_v1 = vld [vmem:[#allocation6 + $0x30] sm:$0xff]  ;;  %s748_s10 = sshll.u32 %s1067_s25, 3  ;;  %s274_s30 = scalar_lea.vmem [#allocation9], %s646_s6 }
  0x31   : > { %345 = vmatpush.bf16.msra.mxu0 %v758_v0  ;;  %v766_v2 = vld [vmem:[#allocation8 + $0x38] sm:$0xff]  ;;  %v765_v3 = vld [vmem:[#allocation8 + $0x30] sm:$0xff]  ;;  %v756_v4 = vld [vmem:[#allocation6 + $0x28] sm:$0xff]  ;;  %s544_s27 = scalar_lea.hbm %s1209_s5, %s748_s10  ;;  %s546_s16 = sshll.u32 %s274_s30, 4  ;;  %s547_s16 = int_to_ptr.vmem [resolvable:$true] %s546_s16 }
  0x32   : > { %430 = vmatpush.bf16.msra.mxu1 %v766_v2  ;;  %v764_v5 = vld [vmem:[#allocation8 + $0x28] sm:$0xff]  ;;  %v755_v6 = vld [vmem:[#allocation6 + $0x20] sm:$0xff]  ;;  %v754_v8 = vld [vmem:[#allocation6 + $0x18] sm:$0xff]  ;;  %s548_s7 = sshll.u32 %s544_s27, 4  ;;  %s957_s9 = scalar_lea.hbm %s1209_s5, 16  ;;  %s549_s7 = int_to_ptr.hbm [resolvable:$true] %s548_s7 }
  0x33   : > { %v763_v7 = vld [vmem:[#allocation8 + $0x20] sm:$0xff]  ;;  %v762_v9 = vld [vmem:[#allocation8 + $0x18] sm:$0xff]  ;;  %v753_v10 = vld [vmem:[#allocation6 + $0x10] sm:$0xff]  ;;  %s951_s25 = sshra.s32 %s549_s7, 4  ;;  %s952_s25 = int_to_ptr.hbm [resolvable:$true] %s951_s25 }
  0x34   : > { %v761_v11 = vld [vmem:[#allocation8 + $0x10] sm:$0xff]  ;;  %v752_v12 = vld [vmem:[#allocation6 + $0x8] sm:$0xff]  ;;  %v751_v13 = vld [vmem:[#allocation6] sm:$0xff]  ;;  %s953_s26 = scalar_lea.hbm %s952_s25, 8  ;;  %p958_p12 = scmp.lt.s32.totalorder %s952_s25, %s1209_s5 }
  0x35   : > { %346 = vmatpush.bf16.msra.mxu0 %v757_v1  ;;  %v275_v14 = vld [vmem:[%s1149_s13] sm:$0xff]  ;;  %v760_v16 = vld [vmem:[#allocation8 + $0x8] sm:$0xff]  ;;  %v759_v17 = vld [vmem:[#allocation8] sm:$0xff]  ;;  %s534_s13 = scalar_lea.sflag [#allocation5], %s1143_s22  ;;  %p954_p1 = scmp.ne.s32.totalorder %s952_s25, %s953_s26 }
  0x36   : > { %431 = vmatpush.bf16.msra.mxu1 %v765_v3  ;;  %v276_v15 = vpack.c.bf16 %v275_v14, %v275_v14  ;;  %v774_v18 = vld [vmem:[#allocation8 + $0x78] sm:$0xff]  ;;  %v773_v19 = vld [vmem:[#allocation8 + $0x70] sm:$0xff]  ;;  %v772_v20 = vld [vmem:[#allocation8 + $0x68] sm:$0xff]  ;;  %p959_p7 = scmp.lt.s32.totalorder %s957_s9, %s953_s26 }
  0x37   : > { %517 = vmatpush.bf16.msra.mxu2 %v774_v18  ;;  %v771_v21 = vld [vmem:[#allocation8 + $0x60] sm:$0xff]  ;;  %v770_v22 = vld [vmem:[#allocation8 + $0x58] sm:$0xff]  ;;  %v769_v23 = vld [vmem:[#allocation8 + $0x50] sm:$0xff]  ;;  %p955_p3 = pnand %p954_p1, %p1112_p4 }
  0x38   : > { %v844_v24 = vld [vmem:[%s1206_s2] ss:$0 sm:$0xff]  ;;  %v768_v30 = vld [vmem:[#allocation8 + $0x48] sm:$0xff]  ;;  %v767_v31 = vld [vmem:[#allocation8 + $0x40] sm:$0xff]  ;;  %p960_p8 = por %p959_p7, %p958_p12 }
  0x39   : > { %347 = vmatpush.bf16.msra.mxu0 %v756_v4  ;;  %v845_v32 = vld [vmem:[%s1208_s4] ss:$0 sm:$0xff]  ;;  %v846_v38 = vld [vmem:[%s1208_s4 + $0x1] ss:$0 sm:$0xff]  ;;  %p956_p5 = pneg %p955_p3 }
  0x3a   : > { %432 = vmatpush.bf16.msra.mxu1 %v764_v5 }
  0x3b   : > { %518 = vmatpush.bf16.msra.mxu2 %v773_v19  ;;  %p961_p9 = pnand %p960_p8, %p956_p5 }
  0x3d   : > { %348 = vmatpush.bf16.msra.mxu0 %v755_v6 }
  0x3e   : > { %433 = vmatpush.bf16.msra.mxu1 %v763_v7 }
  0x3f   : > { %519 = vmatpush.bf16.msra.mxu2 %v772_v20 }
  0x41   : > { %349 = vmatpush.bf16.msra.mxu0 %v754_v8 }
  0x42   : > { %434 = vmatpush.bf16.msra.mxu1 %v762_v9 }
  0x43   : > { %520 = vmatpush.bf16.msra.mxu2 %v771_v21 }
  0x45   : > { %350 = vmatpush.bf16.msra.mxu0 %v753_v10 }
  0x46   : > { %435 = vmatpush.bf16.msra.mxu1 %v761_v11 }
  0x47   : > { %521 = vmatpush.bf16.msra.mxu2 %v770_v22 }
  0x49   : > { %351 = vmatpush.bf16.msra.mxu0 %v752_v12 }
  0x4a   : > { %436 = vmatpush.bf16.msra.mxu1 %v760_v16 }
  0x4b   : > { %522 = vmatpush.bf16.msra.mxu2 %v769_v23 }
  0x4d   : > { %352 = vmatpush.bf16.msra.mxu0 %v751_v13 }
  0x4e   : > { %437 = vmatpush.bf16.msra.mxu1 %v759_v17 }
  0x4f   : > { %523 = vmatpush.bf16.msra.mxu2 %v768_v30 }
  0x50   : > { %353 = vmatmul.bf16.vlgmr.msra.gmra.mxu0 %v276_v15 }
  0x53   : > { %524 = vmatpush.bf16.msra.mxu2 %v767_v31 }
  0xcd   : > { %v354_v25 = vpop.f32.mrf.mxu0 }
  0xce   : > { %v355_v26 = vadd.f32 %v844_v24, %v354_v25 }
  0xd0   : > { %v360_v27 = vmax.f32 %v355_v26, 0.0 }
  0xd2   : > { %v361_v28 = vpack.c.bf16 %v360_v27, %v360_v27 }
  0xd4   : > { %438 = vmatmul.bf16.vlgmr.msra.gmra.mxu1 %v361_v28 }
  0xd5   : > { %v356_v29 = vpop.f32.mrf.mxu0 }
 0x151   : > { %v439_v33 = vpop.f32.mrf.mxu1 }
 0x152   : > { %v440_v34 = vadd.f32 %v845_v32, %v439_v33 }
 0x154   : > { %v445_v35 = vmax.f32 %v440_v34, 0.0 }
 0x156   : > { %v446_v36 = vpack.c.bf16 %v445_v35, %v445_v35 }
 0x158   : > { %525 = vmatmul.bf16.vlgmr.msra.gmra.mxu2 %v446_v36 }
 0x159   : > { %v441_v37 = vpop.f32.mrf.mxu1 }
 0x1db   : > { %v526_v39 = vpop.f32.mrf.mxu2 }
 0x1dc   : > { %v527_v40 = vadd.f32 %v846_v38, %v526_v39 }
 0x1de   : > { %532 = vst [vmem:[%s274_s30] sm:$0xff] %v527_v40 }
 0x1df   : > { %964 = shalt.err (!%p961_p9)
}
 0x1e0   : > { %785 = dma.vmem_to_hbm [thread:$0]  (%p1112_p4), %s547_s16, 128, %s549_s7, %s534_s13  }
 0x1e3   : > { %v528_v41 = vpop.f32.mrf.mxu2 }
 0x1e4 PF: > { %s560_s22 = sand.u32 1, %s995_s18   ;;  %p1216_p10 = scmp.ge.s32.totalorder %s1007_s21, 2 }
 0x1e5   : > { %s561_s11 = scalar_lea.sflag [#allocation5], %s560_s22 }
 0x1e6   : > { %p799_p13 = pnand %p1216_p10, %p1116_p6 }
 0x1e8   : > { %p800_p11 = pneg %p799_p13 }
 0x1ea   : > { %990 = dma.done.wait (%p800_p11), %s561_s11, 128  }
 0x1eb   : > { %992 = vsyncadd (%p800_p11), %s561_s11, 4294967168  ;;  %p19_p0 = scmp.ge.s32.totalorder %s1086_s12, 4   ;;  %s1217_s18 = smov %s999_s19 }
 0x1ec   : > { %s1218_s19 = smov %s1003_s20  ;;  %s1219_s20 = smov %s1097_s15 }
 0x1ed   : > { %s1220_s21 = smov %s1086_s12  ;;  %21 = sbr.rel (!%p19_p0) target bundleno = 6 (0x6), region = 95 }
 0x1f2   :  { %567 = vsyncpa [#allocation4], 1 }
 0x1f3   :  { %569 = vsyncpa [#allocation4 + $0x1], 1 }
 0x1f4   :  { %570 = vsyncpa [#allocation7], 1 }
 0x1f5   :  { %571 = vsyncpa [#allocation5], 1 }
 0x1f6   :  { %573 = vsyncpa [#allocation5 + $0x1], 1 }

</bundles_post_ra>
